<compile_context>
chip_gen: v7x
topology: tpu7x:2x2x1
jax: 0.10.0
libtpu: 0.0.40
codegen_flags: <defaults>
</compile_context>

<pallas_src>
import numpy as np
import jax
import jax.numpy as jnp
from jax.scipy.special import digamma
from jax.experimental import pallas as pl
from jax.experimental.pallas import tpu as pltpu

# ----------------------------- config (args) ---------------------------------
GIVEN_ALPHA = 2.0
GIVEN_BETA = 1.0
CLIPPING = 0.99          # clamp z_learning into [1-clipping, clipping]
N_TASKS = 8              # batch of tasks (x.size(0))
N_WORKERS_PER_TASK = 2
N_TASKS_PER_WORKER = 4
N_WORKER = N_TASKS * N_WORKERS_PER_TASK // N_TASKS_PER_WORKER   # = 4
N_CLASSES = 2
D_FEAT = 16              # classifier input features
HIDDEN = 32              # classifier hidden width


# ------------------------------ Pallas kernel --------------------------------
def deepmf_kernel(x_ref, ann_ref, w1_ref, b_ref, side_ref, loss_ref, acc_ref):
    step = pl.program_id(0)

    @pl.when(step == 0)
    def _init():
        acc_ref[0] = jnp.float32(0.0)

    # ---- classifier layer 1: (BN, D) @ (D, H) -> MXU ----
    h = jnp.dot(x_ref[...], w1_ref[...], preferred_element_type=jnp.float32)
    h = jnp.maximum(h + b_ref[:, :HIDDEN], 0.0)                         # (BN, H)

    # ---- classifier layer 2 on the VPU (C=2 -> too small for the MXU) ----
    side = side_ref[...]                                                # (C, H + 2W)
    w2t = side[:, :HIDDEN]                                              # (C, H)
    logits = jnp.concatenate(
        [jnp.sum(h * w2t[c:c + 1, :], axis=-1, keepdims=True)
         for c in range(N_CLASSES)],
        axis=-1) + b_ref[:, HIDDEN:]                                    # (BN, C)

    # ---- z_learning = clamp(softmax(logits)) + 1e-9 (not renormalized, as in PyTorch) ----
    m1 = jnp.max(logits, axis=-1, keepdims=True)
    e1 = jnp.exp(logits - m1)
    z_learning = e1 * pl.reciprocal(jnp.sum(e1, axis=-1, keepdims=True), approx=False)
    z_learning = jnp.clip(z_learning, 1.0 - CLIPPING, CLIPPING) + 1e-9
    log_zl = jnp.log(z_learning)                                        # (BN, C)

    # ---- per-task digamma correction (fused table), on the VPU ----
    ann = ann_ref[...]                                                  # (BN, W) i32
    mask = ann != -1
    maskf = mask.astype(jnp.float32)
    sel1 = jnp.where(mask, ann, 0).astype(jnp.float32)                  # label==1 selector
    sel0 = maskf - sel1                                                 # label==0 selector
    a0 = side[:, HIDDEN:HIDDEN + N_WORKER]                              # (C, W): dg(.,0)-dg(sum)
    a1 = side[:, HIDDEN + N_WORKER:]                                    # (C, W): dg(.,1)-dg(sum)
    tmp = jnp.concatenate(
        [jnp.sum(sel0 * a0[c:c + 1, :] + sel1 * a1[c:c + 1, :],
                 axis=-1, keepdims=True)
         for c in range(N_CLASSES)],
        axis=-1)                                                        # (BN, C)

    # ---- z_inference = softmax(log z_learning + tmp); log(z_inf) analytically ----
    zi_logit = log_zl + tmp
    m2 = jnp.max(zi_logit, axis=-1, keepdims=True)
    e2 = jnp.exp(zi_logit - m2)
    s2 = jnp.sum(e2, axis=-1, keepdims=True)
    z_inf = e2 * pl.reciprocal(s2, approx=False)
    log_zi = (zi_logit - m2) - jnp.log(s2)

    # ---- KLDivLoss(reduction='sum')(log z_learning, z_inference), accumulated ----
    acc_ref[0] += jnp.sum(z_inf * (log_zi - log_zl))

    @pl.when(step == pl.num_programs(0) - 1)
    def _finalize():
        loss_ref[0] = acc_ref[0]


# ------------------------------ setup / wrapper -------------------------------
def pack_params(w1, b1, w2, b2, confusion):
    """One-time parameter prep: fuse the digamma tables and pack the small arrays.

    Hoisted out of the per-forward path (the confusion buffer is a constant prior).
    """
    dg0 = digamma(confusion[:, :, 0])                # (W, C) digamma(conf[u, c, 0])
    dg1 = digamma(confusion[:, :, 1])                # (W, C) digamma(conf[u, c, 1])
    dgsum = digamma(jnp.sum(confusion, axis=2))      # (W, C) digamma(sum_k conf[u, c, k])
    a0_t = (dg0 - dgsum).T                           # (C, W)
    a1_t = (dg1 - dgsum).T                           # (C, W)
    side = jnp.concatenate([w2.T, a0_t, a1_t], axis=1).astype(jnp.float32)  # (C, H + 2W)
    bias = jnp.concatenate([b1, b2])[None, :].astype(jnp.float32)           # (1, H + C)
    return w1.astype(jnp.float32), bias, side


def deepmf_forward(x, ann, w1, bias, side, *, block_n=None):
    """Returns the scalar KL loss of Model.forward."""
    n, d = x.shape
    w = ann.shape[1]
    if block_n is None:
        # A (block_n, D) f32 block is tiny; cap rows so large-N workloads still leave
        # double-buffering headroom even inside v7x's smaller (64 MiB) VMEM.
        block_n = n if n <= 2048 else 2048
    assert n % block_n == 0, "n_tasks must be a multiple of block_n"
    # TODO(synk): for ragged N (n % block_n != 0), mask padded rows out of the loss.
    grid = (n // block_n,)

    grid_spec = pltpu.PrefetchScalarGridSpec(
        num_scalar_prefetch=0,
        grid=grid,
        in_specs=[
            pl.BlockSpec((block_n, d), lambda i: (i, 0)),    # x   (streamed over tasks)
            pl.BlockSpec((block_n, w), lambda i: (i, 0)),    # ann (streamed over tasks)
            pl.BlockSpec(w1.shape, lambda i: (0, 0)),        # w1      (resident)
            pl.BlockSpec(bias.shape, lambda i: (0, 0)),      # [b1|b2] (resident)
            pl.BlockSpec(side.shape, lambda i: (0, 0)),      # [w2^T | dg tables] (resident)
        ],
        out_specs=pl.BlockSpec(memory_space=pltpu.MemorySpace.SMEM),
        scratch_shapes=[pltpu.SMEM((1,), jnp.float32)],
    )
    out = pl.pallas_call(
        deepmf_kernel,
        out_shape=jax.ShapeDtypeStruct((1,), jnp.float32),
        grid_spec=grid_spec,
        compiler_params=pltpu.CompilerParams(
            # Task axis carries the loss accumulator -> reduction axis.
            # TODO(synk): for v7x dual-TC, emit per-core partial losses and mark "parallel".
            dimension_semantics=("arbitrary",)),
    )(x, ann, w1, bias, side)
    return out[0]


# ------------------------------ pure-JAX reference ---------------------------
def reference_forward(x, ann, w1, b1, w2, b2, confusion):
    h = jnp.maximum(x @ w1 + b1, 0.0)
    logits = h @ w2 + b2
    z_learning = jax.nn.softmax(logits, axis=-1)
    z_learning = jnp.clip(z_learning, 1.0 - CLIPPING, CLIPPING) + 1e-9
    z_inference = jnp.log(z_learning)

    ann_np = np.asarray(ann)
    rows = []
    for t in range(x.shape[0]):
        workers = np.nonzero(ann_np[t] != -1)[0]
        tmp = jnp.zeros((N_CLASSES,), jnp.float32)
        if len(workers) > 0:
            tmp = -jnp.sum(digamma(jnp.sum(confusion[workers], axis=2)), axis=0)
            for u in workers:
                tmp = tmp + digamma(confusion[u, :, int(ann_np[t, u])])
        rows.append(z_inference[t] + tmp)
    zi = jax.nn.softmax(jnp.stack(rows), axis=-1)
    return jnp.sum(zi * (jnp.log(zi) - jnp.log(z_learning)))


# ----------------------------------- main -------------------------------------
if __name__ == "__main__":
    key = jax.random.PRNGKey(0)
    k1, k2, k3, k4, kx, ka = jax.random.split(key, 6)

    # deterministic classifier parameters (synthetic init, no checkpoint)
    w1 = (0.1 * jax.random.normal(k1, (D_FEAT, HIDDEN))).astype(jnp.float32)
    b1 = (0.1 * jax.random.normal(k2, (HIDDEN,))).astype(jnp.float32)
    w2 = (0.1 * jax.random.normal(k3, (HIDDEN, N_CLASSES))).astype(jnp.float32)
    b2 = (0.1 * jax.random.normal(k4, (N_CLASSES,))).astype(jnp.float32)

    # inputs
    x = jax.random.normal(kx, (N_TASKS, D_FEAT), dtype=jnp.float32)
    ann = jax.random.randint(ka, (N_TASKS, N_WORKER), -1, N_CLASSES, dtype=jnp.int32)

    # prior confusion buffer: (n_worker, 2, 2) of [[alpha, beta], [beta, alpha]]
    prior = jnp.array([[GIVEN_ALPHA, GIVEN_BETA], [GIVEN_BETA, GIVEN_ALPHA]], jnp.float32)
    confusion = jnp.tile(prior[None, :, :], (N_WORKER, 1, 1))

    # NOTE: the in-place update of self.confusion in Model.forward is a stateful side
    # effect that does not influence the returned loss, so it is not emitted.
    # TODO(synk): expose updated confusion as an extra output if needed downstream.

    # one-time setup (digamma of the constant prior + parameter packing)
    w1p, bias, side = pack_params(w1, b1, w2, b2, confusion)

    fwd = jax.jit(deepmf_forward)
    loss = fwd(x, ann, w1p, bias, side)
    jax.block_until_ready(loss)

    ref = reference_forward(x, ann, w1, b1, w2, b2, confusion)
    np.testing.assert_allclose(np.asarray(loss), np.asarray(ref), rtol=1e-4, atol=1e-5)

    print("KERNEL_OK")
</pallas_src>

<mosaic_0001>
module attributes {stable_mosaic.version = 11 : i64} {
  func.func @deepmf_kernel(%arg0: i32, %arg1: memref<8x16xf32, #tpu.memory_space<vmem>>, %arg2: memref<8x4xi32, #tpu.memory_space<vmem>>, %arg3: memref<16x32xf32, #tpu.memory_space<vmem>>, %arg4: memref<1x34xf32, #tpu.memory_space<vmem>>, %arg5: memref<2x40xf32, #tpu.memory_space<vmem>>, %arg6: memref<1xf32, #tpu.memory_space<smem>>, %arg7: memref<1xf32, #tpu.memory_space<smem>>) attributes {dimension_semantics = [#tpu.dimension_semantics<arbitrary>], iteration_bounds = array<i64: 1>, scalar_prefetch = 0 : i64, scratch_operands = 1 : i64, tpu.core_type = #tpu.core_type<tc>, window_params = [{transform_indices = @transform_0, window_bounds = array<i64: 8, 16>}, {transform_indices = @transform_1, window_bounds = array<i64: 8, 4>}, {pipeline_mode = #tpu.pipeline_mode<synchronous>, transform_indices = @transform_2, window_bounds = array<i64: 16, 32>}, {pipeline_mode = #tpu.pipeline_mode<synchronous>, transform_indices = @transform_3, window_bounds = array<i64: 1, 34>}, {pipeline_mode = #tpu.pipeline_mode<synchronous>, transform_indices = @transform_4, window_bounds = array<i64: 2, 40>}, {transform_indices = @transform_5, window_bounds = array<i64: 1>}]} {
    %c0_i32 = arith.constant 0 : i32
    %0 = arith.cmpi eq, %arg0, %c0_i32 : i32
    %1 = arith.extui %0 : i1 to i32
    %c0_i32_0 = arith.constant 0 : i32
    %2 = arith.cmpi ne, %1, %c0_i32_0 : i32
    scf.if %2 {
      %cst_29 = arith.constant 0.000000e+00 : f32
      %c0_30 = arith.constant 0 : index
      %102 = memref.load %arg7[%c0_30] : memref<1xf32, #tpu.memory_space<smem>>
      memref.store %cst_29, %arg7[%c0_30] : memref<1xf32, #tpu.memory_space<smem>>
    } else {
    }
    %c0 = arith.constant 0 : index
    %c0_1 = arith.constant 0 : index
    %3 = vector.load %arg1[%c0, %c0_1] : memref<8x16xf32, #tpu.memory_space<vmem>>, vector<8x16xf32>
    %c0_2 = arith.constant 0 : index
    %c0_3 = arith.constant 0 : index
    %4 = vector.load %arg3[%c0_2, %c0_3] : memref<16x32xf32, #tpu.memory_space<vmem>>, vector<16x32xf32>
    %cst = arith.constant dense<0.000000e+00> : vector<8x32xf32>
    %5 = tpu.matmul %3, %4, %cst {dimension_numbers = #tpu.dot_dimension_numbers<[1], [0], [0], [1], [0, 0, 1, 1], [], []>} : vector<8x16xf32>, vector<16x32xf32>, vector<8x32xf32> -> vector<8x32xf32>
    %c0_4 = arith.constant 0 : index
    %c0_5 = arith.constant 0 : index
    %6 = vector.load %arg4[%c0_4, %c0_5] : memref<1x34xf32, #tpu.memory_space<vmem>>, vector<1x32xf32>
    %7 = vector.broadcast %6 : vector<1x32xf32> to vector<8x32xf32>
    %8 = arith.addf %5, %7 : vector<8x32xf32>
    %cst_6 = arith.constant 0.000000e+00 : f32
    %9 = vector.broadcast %cst_6 : f32 to vector<8x32xf32>
    %10 = arith.maximumf %8, %9 : vector<8x32xf32>
    %c0_7 = arith.constant 0 : index
    %c0_8 = arith.constant 0 : index
    %11 = vector.load %arg5[%c0_7, %c0_8] : memref<2x40xf32, #tpu.memory_space<vmem>>, vector<2x40xf32>
    %12 = vector.extract_strided_slice %11 {offsets = [0, 0], sizes = [2, 32], strides = [1, 1]} : vector<2x40xf32> to vector<2x32xf32>
    %13 = vector.extract_strided_slice %12 {offsets = [0, 0], sizes = [1, 32], strides = [1, 1]} : vector<2x32xf32> to vector<1x32xf32>
    %14 = vector.broadcast %13 : vector<1x32xf32> to vector<8x32xf32>
    %15 = arith.mulf %10, %14 : vector<8x32xf32>
    %cst_9 = arith.constant dense<0.000000e+00> : vector<8xf32>
    %16 = vector.multi_reduction <add>, %15, %cst_9 [1] : vector<8x32xf32> to vector<8xf32>
    %17 = vector.shape_cast %16 : vector<8xf32> to vector<8x1xf32>
    %18 = vector.extract_strided_slice %12 {offsets = [1, 0], sizes = [1, 32], strides = [1, 1]} : vector<2x32xf32> to vector<1x32xf32>
    %19 = vector.broadcast %18 : vector<1x32xf32> to vector<8x32xf32>
    %20 = arith.mulf %10, %19 : vector<8x32xf32>
    %cst_10 = arith.constant dense<0.000000e+00> : vector<8xf32>
    %21 = vector.multi_reduction <add>, %20, %cst_10 [1] : vector<8x32xf32> to vector<8xf32>
    %22 = vector.shape_cast %21 : vector<8xf32> to vector<8x1xf32>
    %23 = tpu.concatenate %17, %22 in 1 : vector<8x1xf32>, vector<8x1xf32> -> vector<8x2xf32>
    %c0_11 = arith.constant 0 : index
    %c32 = arith.constant 32 : index
    %24 = vector.load %arg4[%c0_11, %c32] : memref<1x34xf32, #tpu.memory_space<vmem>>, vector<1x2xf32>
    %25 = vector.broadcast %24 : vector<1x2xf32> to vector<8x2xf32>
    %26 = arith.addf %23, %25 : vector<8x2xf32>
    %cst_12 = arith.constant dense<0xFF800000> : vector<8xf32>
    %27 = vector.multi_reduction <maximumf>, %26, %cst_12 [1] : vector<8x2xf32> to vector<8xf32>
    %28 = vector.shape_cast %27 : vector<8xf32> to vector<8x1xf32>
    %29 = vector.broadcast %28 : vector<8x1xf32> to vector<8x2xf32>
    %30 = arith.subf %26, %29 : vector<8x2xf32>
    %31 = math.exp %30 : vector<8x2xf32>
    %cst_13 = arith.constant dense<0.000000e+00> : vector<8xf32>
    %32 = vector.multi_reduction <add>, %31, %cst_13 [1] : vector<8x2xf32> to vector<8xf32>
    %33 = vector.shape_cast %32 : vector<8xf32> to vector<8x1xf32>
    %34 = tpu.reciprocal %33 : vector<8x1xf32> -> vector<8x1xf32>
    %35 = vector.broadcast %34 : vector<8x1xf32> to vector<8x2xf32>
    %36 = arith.mulf %31, %35 : vector<8x2xf32>
    %cst_14 = arith.constant 0.00999999977 : f32
    %cst_15 = arith.constant 9.900000e-01 : f32
    %37 = vector.broadcast %cst_14 : f32 to vector<8x2xf32>
    %38 = arith.maximumf %37, %36 : vector<8x2xf32>
    %39 = vector.broadcast %cst_15 : f32 to vector<8x2xf32>
    %40 = arith.minimumf %39, %38 : vector<8x2xf32>
    %cst_16 = arith.constant 9.99999971E-10 : f32
    %41 = vector.broadcast %cst_16 : f32 to vector<8x2xf32>
    %42 = arith.addf %40, %41 : vector<8x2xf32>
    %43 = math.log %42 : vector<8x2xf32>
    %c0_17 = arith.constant 0 : index
    %c0_18 = arith.constant 0 : index
    %44 = vector.load %arg2[%c0_17, %c0_18] : memref<8x4xi32, #tpu.memory_space<vmem>>, vector<8x4xi32>
    %c-1_i32 = arith.constant -1 : i32
    %45 = vector.broadcast %c-1_i32 : i32 to vector<8x4xi32>
    %46 = arith.cmpi ne, %44, %45 : vector<8x4xi32>
    %47 = arith.extui %46 : vector<8x4xi1> to vector<8x4xi32>
    %48 = arith.sitofp %47 : vector<8x4xi32> to vector<8x4xf32>
    %c0_i32_19 = arith.constant 0 : i32
    %49 = vector.broadcast %c0_i32_19 : i32 to vector<8x4xi32>
    %50 = arith.select %46, %44, %49 : vector<8x4xi1>, vector<8x4xi32>
    %51 = arith.sitofp %50 : vector<8x4xi32> to vector<8x4xf32>
    %52 = arith.subf %48, %51 : vector<8x4xf32>
    %53 = vector.extract_strided_slice %11 {offsets = [0, 32], sizes = [2, 4], strides = [1, 1]} : vector<2x40xf32> to vector<2x4xf32>
    %54 = vector.extract_strided_slice %11 {offsets = [0, 36], sizes = [2, 4], strides = [1, 1]} : vector<2x40xf32> to vector<2x4xf32>
    %55 = vector.extract_strided_slice %53 {offsets = [0, 0], sizes = [1, 4], strides = [1, 1]} : vector<2x4xf32> to vector<1x4xf32>
    %56 = vector.broadcast %55 : vector<1x4xf32> to vector<8x4xf32>
    %57 = arith.mulf %52, %56 : vector<8x4xf32>
    %58 = vector.extract_strided_slice %54 {offsets = [0, 0], sizes = [1, 4], strides = [1, 1]} : vector<2x4xf32> to vector<1x4xf32>
    %59 = vector.broadcast %58 : vector<1x4xf32> to vector<8x4xf32>
    %60 = arith.mulf %51, %59 : vector<8x4xf32>
    %61 = arith.addf %57, %60 : vector<8x4xf32>
    %cst_20 = arith.constant dense<0.000000e+00> : vector<8xf32>
    %62 = vector.multi_reduction <add>, %61, %cst_20 [1] : vector<8x4xf32> to vector<8xf32>
    %63 = vector.shape_cast %62 : vector<8xf32> to vector<8x1xf32>
    %64 = vector.extract_strided_slice %53 {offsets = [1, 0], sizes = [1, 4], strides = [1, 1]} : vector<2x4xf32> to vector<1x4xf32>
    %65 = vector.broadcast %64 : vector<1x4xf32> to vector<8x4xf32>
    %66 = arith.mulf %52, %65 : vector<8x4xf32>
    %67 = vector.extract_strided_slice %54 {offsets = [1, 0], sizes = [1, 4], strides = [1, 1]} : vector<2x4xf32> to vector<1x4xf32>
    %68 = vector.broadcast %67 : vector<1x4xf32> to vector<8x4xf32>
    %69 = arith.mulf %51, %68 : vector<8x4xf32>
    %70 = arith.addf %66, %69 : vector<8x4xf32>
    %cst_21 = arith.constant dense<0.000000e+00> : vector<8xf32>
    %71 = vector.multi_reduction <add>, %70, %cst_21 [1] : vector<8x4xf32> to vector<8xf32>
    %72 = vector.shape_cast %71 : vector<8xf32> to vector<8x1xf32>
    %73 = tpu.concatenate %63, %72 in 1 : vector<8x1xf32>, vector<8x1xf32> -> vector<8x2xf32>
    %74 = arith.addf %43, %73 : vector<8x2xf32>
    %cst_22 = arith.constant dense<0xFF800000> : vector<8xf32>
    %75 = vector.multi_reduction <maximumf>, %74, %cst_22 [1] : vector<8x2xf32> to vector<8xf32>
    %76 = vector.shape_cast %75 : vector<8xf32> to vector<8x1xf32>
    %77 = vector.broadcast %76 : vector<8x1xf32> to vector<8x2xf32>
    %78 = arith.subf %74, %77 : vector<8x2xf32>
    %79 = math.exp %78 : vector<8x2xf32>
    %cst_23 = arith.constant dense<0.000000e+00> : vector<8xf32>
    %80 = vector.multi_reduction <add>, %79, %cst_23 [1] : vector<8x2xf32> to vector<8xf32>
    %81 = vector.shape_cast %80 : vector<8xf32> to vector<8x1xf32>
    %82 = tpu.reciprocal %81 : vector<8x1xf32> -> vector<8x1xf32>
    %83 = vector.broadcast %82 : vector<8x1xf32> to vector<8x2xf32>
    %84 = arith.mulf %79, %83 : vector<8x2xf32>
    %85 = vector.broadcast %76 : vector<8x1xf32> to vector<8x2xf32>
    %86 = arith.subf %74, %85 : vector<8x2xf32>
    %87 = math.log %81 : vector<8x1xf32>
    %88 = vector.broadcast %87 : vector<8x1xf32> to vector<8x2xf32>
    %89 = arith.subf %86, %88 : vector<8x2xf32>
    %c0_24 = arith.constant 0 : index
    %90 = memref.load %arg7[%c0_24] : memref<1xf32, #tpu.memory_space<smem>>
    %91 = arith.subf %89, %43 : vector<8x2xf32>
    %92 = arith.mulf %84, %91 : vector<8x2xf32>
    %93 = vector.shape_cast %92 : vector<8x2xf32> to vector<1x8x2xf32>
    %cst_25 = arith.constant dense<0.000000e+00> : vector<1xf32>
    %94 = vector.multi_reduction <add>, %93, %cst_25 [1, 2] : vector<1x8x2xf32> to vector<1xf32>
    %95 = vector.shape_cast %94 : vector<1xf32> to vector<1x1x1xf32>
    %96 = vector.extract %95[0, 0, 0] : f32 from vector<1x1x1xf32>
    %97 = arith.addf %90, %96 : f32
    %c0_26 = arith.constant 0 : index
    %98 = memref.load %arg7[%c0_26] : memref<1xf32, #tpu.memory_space<smem>>
    memref.store %97, %arg7[%c0_26] : memref<1xf32, #tpu.memory_space<smem>>
    %c0_i32_27 = arith.constant 0 : i32
    %99 = arith.cmpi eq, %arg0, %c0_i32_27 : i32
    %100 = arith.extui %99 : i1 to i32
    %c0_i32_28 = arith.constant 0 : i32
    %101 = arith.cmpi ne, %100, %c0_i32_28 : i32
    scf.if %101 {
      %c0_29 = arith.constant 0 : index
      %102 = memref.load %arg7[%c0_29] : memref<1xf32, #tpu.memory_space<smem>>
      %c0_30 = arith.constant 0 : index
      %103 = memref.load %arg6[%c0_30] : memref<1xf32, #tpu.memory_space<smem>>
      memref.store %102, %arg6[%c0_30] : memref<1xf32, #tpu.memory_space<smem>>
    } else {
    }
    return
  }
  func.func @transform_0(%arg0: i32) -> (i32, i32) {
    %c0_i32 = arith.constant 0 : i32
    %c0_i32_0 = arith.constant 0 : i32
    return %arg0, %c0_i32 : i32, i32
  }
  func.func @transform_1(%arg0: i32) -> (i32, i32) {
    %c0_i32 = arith.constant 0 : i32
    %c0_i32_0 = arith.constant 0 : i32
    return %arg0, %c0_i32 : i32, i32
  }
  func.func @transform_2(%arg0: i32) -> (i32, i32) {
    %c0_i32 = arith.constant 0 : i32
    %c0_i32_0 = arith.constant 0 : i32
    %c0_i32_1 = arith.constant 0 : i32
    return %c0_i32, %c0_i32_0 : i32, i32
  }
  func.func @transform_3(%arg0: i32) -> (i32, i32) {
    %c0_i32 = arith.constant 0 : i32
    %c0_i32_0 = arith.constant 0 : i32
    %c0_i32_1 = arith.constant 0 : i32
    return %c0_i32, %c0_i32_0 : i32, i32
  }
  func.func @transform_4(%arg0: i32) -> (i32, i32) {
    %c0_i32 = arith.constant 0 : i32
    %c0_i32_0 = arith.constant 0 : i32
    %c0_i32_1 = arith.constant 0 : i32
    return %c0_i32, %c0_i32_0 : i32, i32
  }
  func.func @transform_5(%arg0: i32) -> i32 {
    %c0_i32 = arith.constant 0 : i32
    %c0_i32_0 = arith.constant 0 : i32
    return %c0_i32 : i32
  }
}

</mosaic_0001>

<bundles_post_ra>
// kernel: deepmf_forward.1
= control target key start
LH: loop header
LB: loop body
LE: loop exit
PB: predicated region body
PF: predicated region fallthrough
CT: control target
= control target key end

     0   :  { %10 = vsyncpa [#allocation4], 0  ;;  %s409_s0 = inlined_call_operand.hbm [shape: f32[8,16], index: 0, kind: input, shape index: {}]   ;;  %s410_s1 = inlined_call_operand.vmem [shape: s32[8,4], index: 1, kind: input, shape index: {}]   ;;  %s411_s2 = inlined_call_operand.vmem [shape: f32[16,32], index: 2, kind: input, shape index: {}]   ;;  %s412_s3 = inlined_call_operand.vmem [shape: f32[1,34], index: 3, kind: input, shape index: {}]   ;;  %s413_s4 = inlined_call_operand.vmem [shape: f32[2,40], index: 4, kind: input, shape index: {}]   ;;  %s414_s5 = inlined_call_operand.hbm [shape: f32[1], index: 5, kind: output, shape index: {}]  }
   0x1   :  { %11 = vsyncpa [#allocation5], 0  ;;  %s326_s18 = smov [#allocation3]   ;;  %s290_s22 = scalar_lea.hbm %s409_s0, 128 }
   0x2   :  { %s18_s19 = sshll.u32 %s326_s18, 4  ;;  %p291_p0 = scmp.ne.s32.totalorder %s409_s0, %s290_s22  ;;  %s19_s19 = int_to_ptr.vmem [resolvable:$true] %s18_s19 }
   0x3   :  { %p294_p1 = scmp.lt.u32.totalorder %s290_s22, %s409_s0 }
   0x5   :  { %p296_p2 = pnand %p294_p1, %p291_p0 }
   0x7   :  { %299 = shalt.err (!%p296_p2)
}
   0x8   :  { %s300_s27 = scalar_lea.vmem %s19_s19, 128  ;;  %p305_p4 = scmp.lt.s32.totalorder %s19_s19, %s19_s19 }
   0x9   :  { %p301_p3 = scmp.ne.s32.totalorder %s19_s19, %s300_s27  ;;  %p306_p5 = scmp.lt.s32.totalorder %s300_s27, %s300_s27 }
   0xb   :  { %p307_p6 = por %p306_p5, %p305_p4 }
   0xd   :  { %p308_p7 = pnand %p307_p6, %p301_p3 }
   0xf   :  { %311 = shalt.err (!%p308_p7)
}
  0x10   :  { %21 = dma.hbm_to_vmem [thread:$0]  %s409_s0, 128, %s19_s19, [#allocation4]  }
  0x11   :  { %322 = dma.done.wait [#allocation4], 128  }
  0x12   :  { %323 = vsyncadd [#allocation4], 4294967168  ;;  %v327_v0 = vmov 0.0|0.0   ;;  %vm328_vm0 = vmmov 0   ;;  %v329_v1 = vmov 0.0   ;;  %v40_v2 = vld [vmem:[%s411_s2] sm:$0xff]  ;;  %v125_v7 = vlaneseq }
  0x13   :  { %266 = vmatprep.subr.bf16.mxu0 %v327_v0  ;;  %263 = vmatprep.mubr.msk.f32.mxu0 %vm328_vm0, %v329_v1  ;;  %v41_v3 = vld [vmem:[%s411_s2 + $0x8] sm:$0xff]  ;;  %v39_v5 = vld [vmem:[#allocation3] sm:$0xff]  ;;  %vm49_vm1 = vcmask 130048   ;;  %s330_s10 = smov 96   ;;  %vm130_vm2 = vcmask 261120   ;;  %s331_s2 = smov 92  }
  0x14   :  { %v267_v4 = vpack.c.bf16 %v41_v3, %v40_v2  ;;  %v251_v6 = vld [vmem:[%s412_s3] ss:$0 sm:$0xff]  ;;  %v126_v8 = vshrl.u32 %v125_v7, 7  ;;  %vm142_vm3 = vcmask 7168   ;;  %vm148_vm4 = vcmask 15360   ;;  %s312_s15 = scalar_lea.hbm %s414_s5, 16 }
  0x15   :  { %144 = vrot.lane.b32.xlu1 %v251_v6, %s330_s10  ;;  %v124_v10 = vld [vmem:[%s413_s4] sm:$0x3]  ;;  %vm182_vm6 = vcmask 31744   ;;  %p313_p8 = scmp.ne.s32.totalorder %s414_s5, %s312_s15  ;;  %p316_p9 = scmp.lt.u32.totalorder %s312_s15, %s414_s5 }
  0x16   :  { %268 = vmatpush3.bf16.msra.mxu0 %v267_v4  ;;  %v127_v9 = vsub.s32 0, %v126_v8  ;;  %v136_v11 = vsub.s32 1, %v126_v8  ;;  %v165_v28 = vld [vmem:[%s410_s1] sm:$0xff] }
  0x17   :  { %v254_v29 = vcvt.s32.f32 %v165_v28  ;;  %vm166_vm5 = vcmp.ne.s32.totalorder %v165_v28, 4294967295  ;;  %p318_p10 = pnand %p316_p9, %p313_p8 }
  0x18   :  { %v128_v15 = vrot.slane %v124_v10, %v127_v9  ;;  %v137_v17 = vrot.slane %v124_v10, %v136_v11  ;;  %v253_v30 = vsel %vm166_vm5, 1.0, %v329_v1 }
  0x19   :  { %264 = vmatmul.mubr.msk.f32.vlgmr.msra.gmra.mrb[0].mxu0 %vm49_vm1, %v39_v5  ;;  %v255_v31 = vsel %vm166_vm5, %v254_v29, 0.0 }
  0x1a   :  { %v171_v32 = vsub.f32 %v253_v30, %v255_v31 }
  0x87   :  { %v145_v23 = vpop.permute.xlu1 %144 }
  0xec   :  { %v119_v12 = vpop.f32.mrb[0].mxu0 }
  0xed   :  { %v120_v13 = vadd.f32 %v251_v6, %v119_v12  ;;  %v265_v14 = vpop.f32.mrb[1].mxu0 }
  0xef   :  { %v123_v16 = vmax.f32 %v120_v13, 0.0 }
  0xf1   :  { %v129_v18 = vmul.f32 %v128_v15, %v123_v16  ;;  %v138_v20 = vmul.f32 %v137_v17, %v123_v16 }
  0xf3   :  { %v131_v19 = vsel %vm130_vm2, %v129_v18, 0.0  ;;  %v139_v21 = vsel %vm130_vm2, %v138_v20, 0.0 }
  0xf4   :  { %132 = vadd.xlane.f32.xlu0 %v131_v19 }
  0xf8   :  { %140 = vadd.xlane.f32.xlu0 %v139_v21 }
 0x10e   :  { %173 = vrot.lane.b32.xlu0 %v128_v15, %s330_s10 }
 0x112   :  { %177 = vrot.lane.b32.xlu0 %v128_v15, %s331_s2 }
 0x116   :  { %187 = vrot.lane.b32.xlu0 %v137_v17, %s330_s10 }
 0x11a   :  { %191 = vrot.lane.b32.xlu0 %v137_v17, %s331_s2 }
 0x181   :  { %v133_v22 = vpop.xlane.xlu0 %132 }
 0x185   :  { %v141_v24 = vpop.xlane.xlu0 %140 }
 0x186   :  { %v143_v25 = vsel %vm142_vm3, %v133_v22, %v141_v24 }
 0x187   :  { %v147_v26 = vadd.f32 %v145_v23, %v143_v25 }
 0x189   :  { %v149_v27 = vsel %vm148_vm4, %v147_v26, -inf  ;;  %v174_v33 = vpop.permute.xlu0 %173 }
 0x18a   :  { %150 = vmax.xlane.f32.xlu1 %v149_v27  ;;  %v176_v34 = vmul.f32 %v174_v33, %v171_v32 }
 0x18d   :  { %v178_v35 = vpop.permute.xlu0 %177 }
 0x18e   :  { %v180_v36 = vmul.f32 %v255_v31, %v178_v35 }
 0x190   :  { %v181_v37 = vadd.f32 %v180_v36, %v176_v34 }
 0x191   :  { %v188_v38 = vpop.permute.xlu0 %187 }
 0x192   :  { %v183_v39 = vsel %vm182_vm6, %v181_v37, 0.0  ;;  %v190_v40 = vmul.f32 %v188_v38, %v171_v32 }
 0x193   :  { %184 = vadd.xlane.f32.xlu0 %v183_v39 }
 0x195   :  { %v192_v41 = vpop.permute.xlu0 %191 }
 0x196   :  { %v194_v42 = vmul.f32 %v255_v31, %v192_v41 }
 0x198   :  { %v195_v43 = vadd.f32 %v194_v42, %v190_v40 }
 0x19a   :  { %v196_v44 = vsel %vm182_vm6, %v195_v43, 0.0 }
 0x217   :  { %v151_v45 = vpop.xlane.xlu1 %150 }
 0x218   :  { %v152_v46 = vsub.f32 %v147_v26, %v151_v45 }
 0x21a   :  { %v153_v47 = vmul.f32 1.442695, %v152_v46 }
 0x21c   :  { %278 = vpow2.f32 %v153_v47 }
 0x220   :  { %v185_v57 = vpop.xlane.xlu0 %184 }
 0x226   :  { %v279_v48 = vpop.eup %278 }
 0x227   :  { %v155_v49 = vsel %vm148_vm4, %v279_v48, 0.0 }
 0x228   :  { %156 = vadd.xlane.f32.xlu1 %v155_v49 }
 0x22c   :  { %197 = vadd.xlane.f32.xlu1 %v196_v44 }
 0x2b5   :  { %v157_v50 = vpop.xlane.xlu1 %156 }
 0x2b6   :  { %280 = vrcp.f32 %v157_v50 }
 0x2b9   :  { %v198_v56 = vpop.xlane.xlu1 %197 }
 0x2ba   :  { %v199_v60 = vsel %vm142_vm3, %v185_v57, %v198_v56 }
 0x2c0   :  { %v281_v51 = vpop.eup %280 }
 0x2c1   :  { %v159_v52 = vmul.f32 %v281_v51, %v279_v48 }
 0x2c3   :  { %v160_v53 = vmax.f32 %v159_v52, 0.01 }
 0x2c5   :  { %v161_v54 = vmin.f32 %v160_v53, 0.99 }
 0x2c7   :  { %v162_v55 = vadd.f32 1e-09, %v161_v54 }
 0x2c9   :  { %282 = vlog2.f32 %v162_v55 }
 0x2d3   :  { %v283_v58 = vpop.eup %282 }
 0x2d4   :  { %v164_v59 = vmul.f32 0.6931472, %v283_v58 }
 0x2d6   :  { %v200_v61 = vadd.f32 %v199_v60, %v164_v59 }
 0x2d8   :  { %v201_v62 = vsel %vm148_vm4, %v200_v61, -inf }
 0x2d9   :  { %202 = vmax.xlane.f32.xlu1 %v201_v62 }
 0x366   :  { %v203_v63 = vpop.xlane.xlu1 %202 }
 0x367   :  { %v204_v0 = vsub.f32 %v200_v61, %v203_v63 }
 0x369   :  { %v205_v1 = vmul.f32 1.442695, %v204_v0 }
 0x36b   :  { %284 = vpow2.f32 %v205_v1 }
 0x375   :  { %v285_v2 = vpop.eup %284 }
 0x376   :  { %v207_v3 = vsel %vm148_vm4, %v285_v2, 0.0 }
 0x377   :  { %208 = vadd.xlane.f32.xlu1 %v207_v3 }
 0x404   :  { %v209_v4 = vpop.xlane.xlu1 %208 }
 0x405   :  { %286 = vlog2.f32 %v209_v4 }
 0x406   :  { %288 = vrcp.f32 %v209_v4 }
 0x40f   :  { %v287_v5 = vpop.eup %286 }
 0x410   :  { %v213_v6 = vmul.f32 0.6931472, %v287_v5  ;;  %v289_v7 = vpop.eup %288 }
 0x411   :  { %v211_v9 = vmul.f32 %v289_v7, %v285_v2 }
 0x412   :  { %v214_v8 = vsub.f32 %v204_v0, %v213_v6 }
 0x414   :  { %v216_v10 = vsub.f32 %v214_v8, %v164_v59 }
 0x416   :  { %v217_v11 = vmul.f32 %v216_v10, %v211_v9 }
 0x418   :  { %v218_v12 = vsel %vm148_vm4, %v217_v11, 0.0 }
 0x419   :  { %219 = vadd.xlane.f32.xlu1 %v218_v12 }
 0x4a6   :  { %v220_v13 = vpop.xlane.xlu1 %219 }
 0x4a7   :  { %v221_v14 = vrot.slane %v220_v13, 4 }
 0x4a9   :  { %v222_v15 = vadd.f32 %v221_v14, %v220_v13 }
 0x4ab   :  { %v223_v16 = vrot.slane %v222_v15, 2 }
 0x4ad   :  { %v224_v17 = vadd.f32 %v223_v16, %v222_v15 }
 0x4af   :  { %v225_v18 = vrot.slane %v224_v17, 1 }
 0x4b1   :  { %v226_v19 = vadd.f32 %v225_v18, %v224_v17 }
 0x4b3   :  { %269 = vpush %v226_v19 }
 0x4e4   :  { %s270_s1 = spop %269 }
 0x4e5   :  { %236 = sst [smem:[#allocation6]] %s270_s1 }
 0x4e6   :  { %321 = shalt.err (!%p318_p10)
}
 0x4e7   :  { %s332_s20 = smov [#allocation6]  }
 0x4e8   :  { %244 = dma.smem_to_hbm %s332_s20, 16, %s414_s5, [#allocation5]  }
 0x4e9   :  { %324 = dma.done.wait [#allocation5], 16  }
 0x4ea   :  { %325 = vsyncadd [#allocation5], 4294967280 }
 0x4eb   :  { %248 = sfence }
 0x4ec   :  { %249 = vsyncpa [#allocation4], 1 }
 0x4ed   :  { %250 = vsyncpa [#allocation5], 1 }

</bundles_post_ra>
